<compile_context>
chip_gen: v7x
topology: tpu7x:2x2x1
jax: 0.10.0
libtpu: 0.0.40
codegen_flags: <defaults>
</compile_context>

<pallas_src>
import numpy as np

import jax
import jax.numpy as jnp
from jax.experimental import pallas as pl
from jax.experimental.pallas import tpu as pltpu


def _round_up(x, m):
    return ((x + m - 1) // m) * m


def _cnn_kernel(x_ref, wtap_ref, bconv_ref, dw_ref, db_ref, mask_ref, out_ref):
    """Fused conv(k=1..K) + bias + ReLU + masked max-pool + dense + sigmoid.

    x_ref     : [Bt, Lp_tot, Ep]  bf16  (time zero-padded, embed lane-padded)
    wtap_ref  : [K, Ep, KFp]      bf16  fused per-tap filter bank (zero padded)
    bconv_ref : [1, KFp]          f32   fused conv bias
    dw_ref    : [KFp, Pp]         bf16  dense weight (zero padded)
    db_ref    : [1, Pp]           f32   dense bias (zero padded)
    mask_ref  : [Lr, KFp]         f32   1.0 where (t + bank) < L else 0.0
    out_ref   : [Bt, Pp]          f32   sigmoid outputs (lane-dense slab)
    """
    Bt = x_ref.shape[0]
    Ep = x_ref.shape[2]
    K = wtap_ref.shape[0]
    KFp = wtap_ref.shape[2]
    Lr = mask_ref.shape[0]

    # Conv over time == K batched MXU matmuls with M = Bt*Lr rows each.
    # Per-tap slices are read directly from the ref (bounds live ranges); zero
    # padding in wtap / x makes out-of-range taps & padded lanes contribute 0.
    acc = None
    for dt in range(K):
        xs = x_ref[:, dt:dt + Lr, :].reshape(Bt * Lr, Ep)        # [Bt*Lr, Ep] bf16
        part = jnp.dot(xs, wtap_ref[dt],
                       preferred_element_type=jnp.float32)       # [Bt*Lr, KFp] f32
        acc = part if acc is None else acc + part

    # Bias + ReLU in f32 (VPU / v5e-safe), then exact masked max-pool over time.
    r = jnp.maximum(acc + bconv_ref[...], 0.0).reshape(Bt, Lr, KFp)
    pooled = jnp.max(r * mask_ref[...], axis=1)                  # [Bt, KFp] f32

    # Dense + sigmoid for the whole batch tile: single bf16 MXU pass, f32 bias.
    logits = jnp.dot(pooled.astype(jnp.bfloat16), dw_ref[...],
                     preferred_element_type=jnp.float32) + db_ref[...]
    # TODO(synk): nn.Dropout is identity at inference; train-mode dropout not implemented.
    out_ref[...] = jax.nn.sigmoid(logits)                        # [Bt, Pp] f32


def init_params(key, vocab_size, embed_dim, n_filters, max_kernel_size, polarities_dim):
    """Deterministic synthetic parameters matching the PyTorch module's shapes."""
    ks = jax.random.split(key, 2 * max_kernel_size + 3)
    params = {}
    params["embedding"] = jax.random.normal(ks[0], (vocab_size, embed_dim), jnp.float32) * 0.1
    for k in range(1, max_kernel_size + 1):
        # torch Conv2d weight is [F, 1, k, E]; we keep [F, k, E].
        params[f"conv_w_{k}"] = jax.random.normal(
            ks[2 * k - 1], (n_filters, k, embed_dim), jnp.float32) * 0.1
        params[f"conv_b_{k}"] = jax.random.normal(ks[2 * k], (n_filters,), jnp.float32) * 0.01
    params["dense_w"] = jax.random.normal(
        ks[-2], (polarities_dim, max_kernel_size * n_filters), jnp.float32) * 0.1
    params["dense_b"] = jax.random.normal(ks[-1], (polarities_dim,), jnp.float32) * 0.01
    # weight1 / weight2 of the PyTorch module are unused in forward(); omitted.
    return params


def cnn_forward(text_raw_indices, params, *, max_kernel_size):
    K = max_kernel_size
    # Embedding lookup is glue (gather) in plain JAX; the hot path is in Pallas.
    emb = params["embedding"]
    x = jnp.take(emb, text_raw_indices, axis=0)                    # [B, L, E] f32
    B, L, E = x.shape
    F = params["conv_b_1"].shape[0]
    P = params["dense_b"].shape[0]
    assert L >= K, "sequence length must be >= max_kernel_size"

    KF = K * F
    KFp = _round_up(KF, 128)           # lane-dense fused conv / pooled feature width
    Pp = _round_up(P, 128)             # lane-dense output slab (sliced back below)
    Ep = _round_up(E, 128)             # lane-dense embedding width
    Lr = _round_up(L, 8)               # conv time positions iterated (sublane-aligned)
    Lp_tot = _round_up(Lr + K - 1, 8)  # padded x time rows (every tap reads statically)

    # Fused per-tap filter bank: wtap[dt, e, (k-1)*F + f] = conv_w_k[f, dt, e]
    # for dt < k, else 0.  Collapses K(K+1)/2 tiny matmuls into K wide ones.
    wtap = jnp.zeros((K, Ep, KFp), jnp.float32)
    bconv = jnp.zeros((1, KFp), jnp.float32)
    for k in range(1, K + 1):
        wk = jnp.transpose(params[f"conv_w_{k}"], (1, 2, 0))       # [k, E, F]
        wtap = wtap.at[:k, :E, (k - 1) * F:k * F].set(wk)
        bconv = bconv.at[0, (k - 1) * F:k * F].set(params[f"conv_b_{k}"])

    dw = jnp.zeros((KFp, Pp), jnp.float32).at[:KF, :P].set(params["dense_w"].T)
    db = jnp.zeros((1, Pp), jnp.float32).at[0, :P].set(params["dense_b"])

    # Hoisted max-pool validity mask: lane j belongs to bank j // F; its conv
    # output is only defined for time t with t + bank < L.  Post-ReLU values are
    # >= 0 and every bank has >= 1 valid position, so masking to 0 is exact.
    t_idx = np.arange(Lr)[:, None]
    bank = np.arange(KFp)[None, :] // F
    mask = jnp.asarray(((t_idx + bank) < L).astype(np.float32))    # [Lr, KFp]

    # --- VMEM-budgeted batch tile -------------------------------------------
    # Per-batch-row VMEM: double-buffered bf16 x tile + f32 conv intermediates
    # (acc + relu) + double-buffered f32 output slab.
    per_row = (2 * 2 * Lp_tot * Ep          # x, bf16, 2 pipeline buffers
               + 2 * 4 * Lr * KFp           # f32 acc + post-ReLU intermediate
               + 2 * 4 * Pp)                # out, f32, 2 pipeline buffers
    fixed = 2 * (wtap.size * 2 + dw.size * 2
                 + (bconv.size + db.size + mask.size) * 4)
    budget = 20 * 1024 * 1024               # safe on v5e/v6e/v7x scoped VMEM
    bt_max = max(8, ((budget - fixed) // per_row) // 8 * 8)

    # Always give the grid >= 2 "parallel" steps (v7x has 2 TensorCores).
    B_pad = max(_round_up(B, 8), 16)
    Bt = int(min(bt_max, _round_up(pl.cdiv(B_pad, 2), 8)))
    B_pad = _round_up(B_pad, Bt)
    grid = (B_pad // Bt,)

    # Pad x (batch -> B_pad, time -> Lp_tot, embed -> Ep); bf16 on the MXU/DMA path.
    x_pad = jnp.zeros((B_pad, Lp_tot, Ep), jnp.bfloat16)
    x_pad = x_pad.at[:B, :L, :E].set(x.astype(jnp.bfloat16))

    wtap = wtap.astype(jnp.bfloat16)
    dw = dw.astype(jnp.bfloat16)

    cost = pl.CostEstimate(
        flops=int(2 * B_pad * Lr * Ep * KFp * K + 2 * B_pad * KFp * Pp),
        transcendentals=int(B_pad * Pp),
        bytes_accessed=int(x_pad.size * 2 + wtap.size * 2 + dw.size * 2
                           + (bconv.size + db.size + mask.size) * 4
                           + B_pad * Pp * 4),
    )

    out_padded = pl.pallas_call(
        _cnn_kernel,
        out_shape=jax.ShapeDtypeStruct((B_pad, Pp), jnp.float32),
        grid=grid,
        in_specs=[
            pl.BlockSpec((Bt, Lp_tot, Ep), lambda i: (i, 0, 0)),
            pl.BlockSpec((K, Ep, KFp), lambda i: (0, 0, 0)),
            pl.BlockSpec((1, KFp), lambda i: (0, 0)),
            pl.BlockSpec((KFp, Pp), lambda i: (0, 0)),
            pl.BlockSpec((1, Pp), lambda i: (0, 0)),
            pl.BlockSpec((Lr, KFp), lambda i: (0, 0)),
        ],
        out_specs=pl.BlockSpec((Bt, Pp), lambda i: (i, 0)),
        compiler_params=pltpu.CompilerParams(
            dimension_semantics=("parallel",),
            vmem_limit_bytes=48 * 1024 * 1024),
        cost_estimate=cost,
    )(x_pad, wtap, bconv, dw, db, mask)

    return out_padded[:B, :P]


def _reference_forward(text_raw_indices, params, *, max_kernel_size):
    """Pure-JAX mirror of the PyTorch forward (f32) for a correctness check."""
    x = jnp.take(params["embedding"], text_raw_indices, axis=0)    # [B, L, E]
    L = x.shape[1]
    feats = []
    for k in range(1, max_kernel_size + 1):
        w = params[f"conv_w_{k}"]                                  # [F, k, E]
        b = params[f"conv_b_{k}"]
        Lk = L - k + 1
        conv = jnp.stack(
            [jnp.einsum("bke,fke->bf", x[:, t:t + k, :], w) for t in range(Lk)],
            axis=2) + b[None, :, None]                             # [B, F, Lk]
        conv = jax.nn.relu(conv)
        feats.append(jnp.max(conv, axis=2))                        # [B, F]
    feat = jnp.concatenate(feats, axis=1)                          # [B, K*F]
    logits = feat @ params["dense_w"].T + params["dense_b"]
    return jax.nn.sigmoid(logits)


if __name__ == "__main__":
    # Small shapes consistent with the module.
    B, L = 2, 16                     # batch, sequence length
    VOCAB, EMBED = 50, 32            # embedding_matrix shape
    N_FILTERS, MAX_K, POLAR = 8, 3, 3

    key = jax.random.PRNGKey(0)
    pkey, ikey = jax.random.split(key)
    params = init_params(pkey, VOCAB, EMBED, N_FILTERS, MAX_K, POLAR)
    text_raw_indices = jax.random.randint(ikey, (B, L), 0, VOCAB, dtype=jnp.int32)

    out = cnn_forward(text_raw_indices, params, max_kernel_size=MAX_K)
    out = jax.block_until_ready(out)

    ref = _reference_forward(text_raw_indices, params, max_kernel_size=MAX_K)
    assert out.shape == (B, POLAR)
    assert bool(jnp.all(jnp.isfinite(out)))
    assert bool(jnp.allclose(out, ref, atol=2e-2)), "mismatch vs reference"
    print("KERNEL_OK")
</pallas_src>

<mosaic_0001>
module attributes {stable_mosaic.version = 11 : i64} {
  func.func @_cnn_kernel(%arg0: i32, %arg1: memref<8x24x128xbf16, #tpu.memory_space<vmem>>, %arg2: memref<3x128x128xbf16, #tpu.memory_space<vmem>>, %arg3: memref<1x128xf32, #tpu.memory_space<vmem>>, %arg4: memref<128x128xbf16, #tpu.memory_space<vmem>>, %arg5: memref<1x128xf32, #tpu.memory_space<vmem>>, %arg6: memref<16x128xf32, #tpu.memory_space<vmem>>, %arg7: memref<8x128xf32, #tpu.memory_space<vmem>>) attributes {dimension_semantics = [#tpu.dimension_semantics<parallel>], iteration_bounds = array<i64: 2>, scalar_prefetch = 0 : i64, scratch_operands = 0 : i64, tpu.core_type = #tpu.core_type<tc>, window_params = [{transform_indices = @transform_0, window_bounds = array<i64: 8, 24, 128>}, {pipeline_mode = #tpu.pipeline_mode<synchronous>, transform_indices = @transform_1, window_bounds = array<i64: 3, 128, 128>}, {pipeline_mode = #tpu.pipeline_mode<synchronous>, transform_indices = @transform_2, window_bounds = array<i64: 1, 128>}, {pipeline_mode = #tpu.pipeline_mode<synchronous>, transform_indices = @transform_3, window_bounds = array<i64: 128, 128>}, {pipeline_mode = #tpu.pipeline_mode<synchronous>, transform_indices = @transform_4, window_bounds = array<i64: 1, 128>}, {pipeline_mode = #tpu.pipeline_mode<synchronous>, transform_indices = @transform_5, window_bounds = array<i64: 16, 128>}, {transform_indices = @transform_6, window_bounds = array<i64: 8, 128>}]} {
    %c0 = arith.constant 0 : index
    %c0_0 = arith.constant 0 : index
    %c0_1 = arith.constant 0 : index
    %0 = vector.load %arg1[%c0, %c0_0, %c0_1] : memref<8x24x128xbf16, #tpu.memory_space<vmem>>, vector<8x16x128xbf16>
    %1 = vector.shape_cast %0 : vector<8x16x128xbf16> to vector<128x128xbf16>
    %c0_2 = arith.constant 0 : index
    %c0_3 = arith.constant 0 : index
    %c0_4 = arith.constant 0 : index
    %2 = vector.load %arg2[%c0_2, %c0_3, %c0_4] : memref<3x128x128xbf16, #tpu.memory_space<vmem>>, vector<1x128x128xbf16>
    %3 = vector.shape_cast %2 : vector<1x128x128xbf16> to vector<128x128xbf16>
    %cst = arith.constant dense<0.000000e+00> : vector<128x128xf32>
    %4 = tpu.matmul %1, %3, %cst {dimension_numbers = #tpu.dot_dimension_numbers<[1], [0], [0], [1], [0, 0, 1, 1], [], []>} : vector<128x128xbf16>, vector<128x128xbf16>, vector<128x128xf32> -> vector<128x128xf32>
    %c0_5 = arith.constant 0 : index
    %c1 = arith.constant 1 : index
    %c0_6 = arith.constant 0 : index
    %5 = vector.load %arg1[%c0_5, %c1, %c0_6] : memref<8x24x128xbf16, #tpu.memory_space<vmem>>, vector<8x16x128xbf16>
    %6 = vector.shape_cast %5 : vector<8x16x128xbf16> to vector<128x128xbf16>
    %c1_7 = arith.constant 1 : index
    %c0_8 = arith.constant 0 : index
    %c0_9 = arith.constant 0 : index
    %7 = vector.load %arg2[%c1_7, %c0_8, %c0_9] : memref<3x128x128xbf16, #tpu.memory_space<vmem>>, vector<1x128x128xbf16>
    %8 = vector.shape_cast %7 : vector<1x128x128xbf16> to vector<128x128xbf16>
    %cst_10 = arith.constant dense<0.000000e+00> : vector<128x128xf32>
    %9 = tpu.matmul %6, %8, %cst_10 {dimension_numbers = #tpu.dot_dimension_numbers<[1], [0], [0], [1], [0, 0, 1, 1], [], []>} : vector<128x128xbf16>, vector<128x128xbf16>, vector<128x128xf32> -> vector<128x128xf32>
    %10 = arith.addf %4, %9 : vector<128x128xf32>
    %c0_11 = arith.constant 0 : index
    %c2 = arith.constant 2 : index
    %c0_12 = arith.constant 0 : index
    %11 = vector.load %arg1[%c0_11, %c2, %c0_12] : memref<8x24x128xbf16, #tpu.memory_space<vmem>>, vector<8x16x128xbf16>
    %12 = vector.shape_cast %11 : vector<8x16x128xbf16> to vector<128x128xbf16>
    %c2_13 = arith.constant 2 : index
    %c0_14 = arith.constant 0 : index
    %c0_15 = arith.constant 0 : index
    %13 = vector.load %arg2[%c2_13, %c0_14, %c0_15] : memref<3x128x128xbf16, #tpu.memory_space<vmem>>, vector<1x128x128xbf16>
    %14 = vector.shape_cast %13 : vector<1x128x128xbf16> to vector<128x128xbf16>
    %cst_16 = arith.constant dense<0.000000e+00> : vector<128x128xf32>
    %15 = tpu.matmul %12, %14, %cst_16 {dimension_numbers = #tpu.dot_dimension_numbers<[1], [0], [0], [1], [0, 0, 1, 1], [], []>} : vector<128x128xbf16>, vector<128x128xbf16>, vector<128x128xf32> -> vector<128x128xf32>
    %16 = arith.addf %10, %15 : vector<128x128xf32>
    %c0_17 = arith.constant 0 : index
    %c0_18 = arith.constant 0 : index
    %17 = vector.load %arg3[%c0_17, %c0_18] : memref<1x128xf32, #tpu.memory_space<vmem>>, vector<1x128xf32>
    %18 = vector.broadcast %17 : vector<1x128xf32> to vector<128x128xf32>
    %19 = arith.addf %16, %18 : vector<128x128xf32>
    %cst_19 = arith.constant 0.000000e+00 : f32
    %20 = vector.broadcast %cst_19 : f32 to vector<128x128xf32>
    %21 = arith.maximumf %19, %20 : vector<128x128xf32>
    %22 = vector.shape_cast %21 : vector<128x128xf32> to vector<8x16x128xf32>
    %c0_20 = arith.constant 0 : index
    %c0_21 = arith.constant 0 : index
    %23 = vector.load %arg6[%c0_20, %c0_21] : memref<16x128xf32, #tpu.memory_space<vmem>>, vector<16x128xf32>
    %24 = vector.shape_cast %23 : vector<16x128xf32> to vector<1x16x128xf32>
    %25 = vector.broadcast %24 : vector<1x16x128xf32> to vector<8x16x128xf32>
    %26 = arith.mulf %22, %25 : vector<8x16x128xf32>
    %cst_22 = arith.constant dense<0xFF800000> : vector<8x128xf32>
    %27 = vector.multi_reduction <maximumf>, %26, %cst_22 [1] : vector<8x16x128xf32> to vector<8x128xf32>
    %28 = arith.truncf %27 : vector<8x128xf32> to vector<8x128xbf16>
    %c0_23 = arith.constant 0 : index
    %c0_24 = arith.constant 0 : index
    %29 = vector.load %arg4[%c0_23, %c0_24] : memref<128x128xbf16, #tpu.memory_space<vmem>>, vector<128x128xbf16>
    %cst_25 = arith.constant dense<0.000000e+00> : vector<8x128xf32>
    %30 = tpu.matmul %28, %29, %cst_25 {dimension_numbers = #tpu.dot_dimension_numbers<[1], [0], [0], [1], [0, 0, 1, 1], [], []>} : vector<8x128xbf16>, vector<128x128xbf16>, vector<8x128xf32> -> vector<8x128xf32>
    %c0_26 = arith.constant 0 : index
    %c0_27 = arith.constant 0 : index
    %31 = vector.load %arg5[%c0_26, %c0_27] : memref<1x128xf32, #tpu.memory_space<vmem>>, vector<1x128xf32>
    %32 = vector.broadcast %31 : vector<1x128xf32> to vector<8x128xf32>
    %33 = arith.addf %30, %32 : vector<8x128xf32>
    %34 = arith.negf %33 : vector<8x128xf32>
    %35 = math.exp %34 : vector<8x128xf32>
    %cst_28 = arith.constant 1.000000e+00 : f32
    %36 = vector.broadcast %cst_28 : f32 to vector<8x128xf32>
    %37 = arith.addf %36, %35 : vector<8x128xf32>
    %38 = arith.divf %36, %37 : vector<8x128xf32>
    %c0_29 = arith.constant 0 : index
    %c0_30 = arith.constant 0 : index
    %39 = vector.load %arg7[%c0_29, %c0_30] : memref<8x128xf32, #tpu.memory_space<vmem>>, vector<8x128xf32>
    tpu.vector_store %arg7[%c0_29, %c0_30], %38 {strides = array<i32>} : memref<8x128xf32, #tpu.memory_space<vmem>>, vector<8x128xf32>,
    return
  }
  func.func @transform_0(%arg0: i32) -> (i32, i32, i32) {
    %c0_i32 = arith.constant 0 : i32
    %c0_i32_0 = arith.constant 0 : i32
    %c0_i32_1 = arith.constant 0 : i32
    return %arg0, %c0_i32, %c0_i32_0 : i32, i32, i32
  }
  func.func @transform_1(%arg0: i32) -> (i32, i32, i32) {
    %c0_i32 = arith.constant 0 : i32
    %c0_i32_0 = arith.constant 0 : i32
    %c0_i32_1 = arith.constant 0 : i32
    %c0_i32_2 = arith.constant 0 : i32
    return %c0_i32, %c0_i32_0, %c0_i32_1 : i32, i32, i32
  }
  func.func @transform_2(%arg0: i32) -> (i32, i32) {
    %c0_i32 = arith.constant 0 : i32
    %c0_i32_0 = arith.constant 0 : i32
    %c0_i32_1 = arith.constant 0 : i32
    return %c0_i32, %c0_i32_0 : i32, i32
  }
  func.func @transform_3(%arg0: i32) -> (i32, i32) {
    %c0_i32 = arith.constant 0 : i32
    %c0_i32_0 = arith.constant 0 : i32
    %c0_i32_1 = arith.constant 0 : i32
    return %c0_i32, %c0_i32_0 : i32, i32
  }
  func.func @transform_4(%arg0: i32) -> (i32, i32) {
    %c0_i32 = arith.constant 0 : i32
    %c0_i32_0 = arith.constant 0 : i32
    %c0_i32_1 = arith.constant 0 : i32
    return %c0_i32, %c0_i32_0 : i32, i32
  }
  func.func @transform_5(%arg0: i32) -> (i32, i32) {
    %c0_i32 = arith.constant 0 : i32
    %c0_i32_0 = arith.constant 0 : i32
    %c0_i32_1 = arith.constant 0 : i32
    return %c0_i32, %c0_i32_0 : i32, i32
  }
  func.func @transform_6(%arg0: i32) -> (i32, i32) {
    %c0_i32 = arith.constant 0 : i32
    %c0_i32_0 = arith.constant 0 : i32
    return %arg0, %c0_i32 : i32, i32
  }
}

</mosaic_0001>

<bundles_post_ra>
// kernel: tpu_custom_call.1
= control target key start
LH: loop header
LB: loop body
LE: loop exit
PB: predicated region body
PF: predicated region fallthrough
CT: control target
= control target key end

     0   :  { %11 = vsyncpa [#allocation3], 0  ;;  %s2717_s0 = inlined_call_operand.hbm [shape: bf16[16,24,128], index: 0, kind: input, shape index: {}]   ;;  %s2718_s1 = inlined_call_operand.hbm [shape: bf16[3,128,128], index: 1, kind: input, shape index: {}]   ;;  %s2719_s2 = inlined_call_operand.vmem [shape: f32[1,128], index: 2, kind: input, shape index: {}]   ;;  %s2720_s3 = inlined_call_operand.hbm [shape: bf16[128,128], index: 3, kind: input, shape index: {}]   ;;  %s2721_s4 = inlined_call_operand.vmem [shape: f32[1,128], index: 4, kind: input, shape index: {}]   ;;  %s2722_s5 = inlined_call_operand.vmem [shape: f32[16,128], index: 5, kind: input, shape index: {}]   ;;  %s2723_s6 = inlined_call_operand.hbm [shape: f32[16,128], index: 6, kind: output, shape index: {}]  }
   0x1   :  { %13 = vsyncpa [#allocation3 + $0x1], 0 }
   0x2   :  { %14 = vsyncpa [#allocation6], 0 }
   0x3   :  { %15 = vsyncpa [#allocation4], 0 }
   0x4   :  { %17 = vsyncpa [#allocation4 + $0x1], 0  ;;  %s2222_s21 = smov 0   ;;  %s2224_s22 = smov 0  }
   0x5   :  { %s2226_s23 = smov 0   ;;  %s2228_s24 = smov 0  }
   0x6 LB: > { %s2243_s25 = sadd.s32 4294967295, %s2177_s24   ;;  %s1615_s26 = sadd.s32 4294967294, %s2177_s24   ;;  %s2177_s24 = sphi %s2228_s24, %s2751_s24   ;;  %s2173_s23 = sphi %s2226_s23, %s2750_s23   ;;  %s2169_s22 = sphi %s2224_s22, %s2749_s22   ;;  %s2165_s21 = sphi %s2222_s21, %s2748_s21  }
   0x7   : > { %p43_p0 = scmp.ne.s32.totalorder %s2169_s22, %s2165_s21  ;;  %p2724_p1 = scmp.eq.s32.totalorder %s2243_s25, 0 }
   0x8   : > { %p178_p3 = scmp.eq.s32.totalorder %s1615_s26, 1  ;;  %p1616_p5 = scmp.ge.s32.totalorder %s2177_s24, 1 }
   0x9   : > { %p2252_p4 = por %p2724_p1, %p43_p0  ;;  %p185_p7 = scmp.lt.s32.totalorder %s2177_s24, 3 }
   0xa   : > { %p2257_p6 = por %p178_p3, %p43_p0  ;;  %s2179_s30 = smov [#allocation5]  }
   0xb   : > { %s2729_s27 = scalar_select %p2252_p4, 1, 0 }
   0xc   : > { %s2730_s28 = scalar_select %p2257_p6, 1, 0 }
   0xd   : > { %p2262_p8 = pnand %p1616_p5, %p185_p7  ;;  %s197_s7 = sshll.u32 %s2179_s30, 4  ;;  %s2266_s7 = int_to_ptr.vmem [resolvable:$true] %s197_s7 }
   0xe   : > { %s2180_s9 = smov [#allocation7]   ;;  %s2021_s13 = scalar_lea.hbm %s2718_s1, 3072 }
   0xf   : > { %p1918_p9 = pneg %p2262_p8  ;;  %s213_s10 = sshll.u32 %s2180_s9, 4  ;;  %s2277_s10 = int_to_ptr.vmem [resolvable:$true] %s213_s10 }
  0x10   : > { %p2022_p12 = scmp.ne.s32.totalorder %s2718_s1, %s2021_s13  ;;  %p2028_p5 = scmp.lt.u32.totalorder %s2021_s13, %s2718_s1 }
  0x11   : > { %p2273_p11 = pnand %p1918_p9, %p2724_p1 }
  0x13   : > { %p2023_p13 = pneg %p2273_p11 }
  0x15   : > { %p2024_p0 = pnand %p2023_p13, %p2022_p12 }
  0x17   : > { %p2025_p3 = pneg %p2024_p0 }
  0x19   : > { %p2030_p7 = pnand %p2028_p5, %p2025_p3 }
  0x1b   : > { %2033 = shalt.err (!%p2030_p7)
}
  0x1c   : > { %s2034_s18 = scalar_lea.vmem %s2266_s7, 3072  ;;  %p2042_p2 = scmp.lt.s32.totalorder %s2266_s7, %s2266_s7 }
  0x1d   : > { %p2035_p9 = scmp.ne.s32.totalorder %s2266_s7, %s2034_s18  ;;  %p2043_p12 = scmp.lt.s32.totalorder %s2034_s18, %s2034_s18 }
  0x1f   : > { %p2037_p10 = pnand %p2035_p9, %p2023_p13  ;;  %p2044_p0 = por %p2043_p12, %p2042_p2 }
  0x21   : > { %p2038_p1 = pneg %p2037_p10 }
  0x23   : > { %p2045_p6 = pnand %p2044_p0, %p2038_p1 }
  0x25   : > { %2048 = shalt.err (!%p2045_p6)
}
  0x26   : > { %s2725_s19 = smov 64   ;;  %s2726_s20 = smov 4  }
  0x27   : > { %1921 = dma.hbm_to_vmem [thread:$0]  (!%p2273_p11), %s2718_s1, 3072, %s2266_s7, [#allocation6], %s2725_s19, %s2725_s19, %s2726_s20  }
  0x28   : > { %s2049_s12 = scalar_lea.hbm %s2720_s3, 1024 }
  0x29   : > { %p2050_p1 = scmp.ne.s32.totalorder %s2720_s3, %s2049_s12  ;;  %p2056_p10 = scmp.lt.u32.totalorder %s2049_s12, %s2720_s3 }
  0x2b   : > { %p2052_p2 = pnand %p2050_p1, %p2023_p13 }
  0x2d   : > { %p2053_p6 = pneg %p2052_p2 }
  0x2f   : > { %p2058_p3 = pnand %p2056_p10, %p2053_p6 }
  0x31   : > { %2061 = shalt.err (!%p2058_p3)
}
  0x32   : > { %s2062_s7 = scalar_lea.vmem %s2277_s10, 1024  ;;  %p2070_p12 = scmp.lt.s32.totalorder %s2277_s10, %s2277_s10 }
  0x33   : > { %p2063_p5 = scmp.ne.s32.totalorder %s2277_s10, %s2062_s7  ;;  %p2071_p0 = scmp.lt.s32.totalorder %s2062_s7, %s2062_s7 }
  0x35   : > { %p2065_p7 = pnand %p2063_p5, %p2023_p13  ;;  %p2072_p1 = por %p2071_p0, %p2070_p12 }
  0x37   : > { %p2066_p9 = pneg %p2065_p7 }
  0x39   : > { %p2073_p2 = pnand %p2072_p1, %p2066_p9 }
  0x3b   : > { %2076 = shalt.err (!%p2073_p2)
}
  0x3c   : > { %1924 = dma.hbm_to_vmem [thread:$0]  (!%p2273_p11), %s2720_s3, 1024, %s2277_s10, [#allocation6], %s2725_s19, %s2725_s19, %s2726_s20  }
  0x3d   : > { %s2338_s8 = sadd.s32 1, %s2177_s24   ;;  %s30_s26 = sadd.s32 1, %s2173_s23 }
  0x3e   : > { %s27_s30 = ssub.s32 %s2177_s24, %s2338_s8  ;;  %p37_p13 = scmp.ne.s32.totalorder %s2173_s23, %s2169_s22 }
  0x3f   : > { %p28_p6 = scmp.eq.s32.totalorder %s27_s30, 0  ;;  %p38_p10 = scmp.eq.s32.totalorder %s2177_s24, 0 }
  0x40   : > { %p2733_p3 = scmp.eq.s32.totalorder %s2243_s25, 1  ;;  %p1935_p7 = scmp.lt.s32.totalorder %s2177_s24, 2 }
  0x41   : > { %s2354_s11 = scalar_select %p28_p6, %s2173_s23, %s30_s26  }
  0x42   : > { %p2348_p5 = por %p2733_p3, %p37_p13  ;;  %p39_p9 = por %p38_p10, %p37_p13 }
  0x43   : > { %s233_s12 = sand.u32 1, %s2173_s23   ;;  %s1904_s10 = smul.u32 1536, %s2177_s24 }
  0x44   : > { %s2734_s9 = scalar_select %p2348_p5, 1, 0 }
  0x45   : > { %s1903_s13 = smul.u32 96, %s233_s12  ;;  %p2358_p11 = pnand %p1935_p7, %p39_p9 }
  0x46   : > { %s2365_s7 = scalar_lea.hbm %s2717_s0, %s1904_s10  ;;  %s2369_s26 = scalar_lea.sflag [#allocation3], %s233_s12 }
  0x47   : > { %s237_s17 = scalar_lea.vmem [#allocation2], %s1903_s13  ;;  %s2077_s30 = scalar_lea.hbm %s2365_s7, 1536 }
  0x48   : > { %s245_s18 = sshll.u32 %s237_s17, 4  ;;  %p2078_p12 = scmp.ne.s32.totalorder %s2365_s7, %s2077_s30  ;;  %s2367_s18 = int_to_ptr.vmem [resolvable:$true] %s245_s18 }
  0x49   : > { %p2079_p0 = pneg %p2358_p11  ;;  %s2082_s16 = scalar_lea.hbm %s2717_s0, 3072 }
  0x4a   : > { %p2083_p13 = scmp.lt.u32.totalorder %s2365_s7, %s2717_s0  ;;  %p2084_p6 = scmp.lt.u32.totalorder %s2082_s16, %s2077_s30 }
  0x4b   : > { %p2080_p1 = pnand %p2079_p0, %p2078_p12  ;;  %p2086_p3 = scmp.lt.u32.totalorder %s2077_s30, %s2365_s7 }
  0x4c   : > { %p2085_p10 = por %p2084_p6, %p2083_p13 }
  0x4d   : > { %p2081_p2 = pneg %p2080_p1 }
  0x4e   : > { %p2087_p7 = por %p2086_p3, %p2085_p10 }
  0x50   : > { %p2088_p9 = pnand %p2087_p7, %p2081_p2 }
  0x52   : > { %2091 = shalt.err (!%p2088_p9)
}
  0x53   : > { %s2092_s12 = scalar_lea.vmem %s2367_s18, 1536  ;;  %s2183_s13 = smov [#allocation2]  }
  0x54   : > { %p2093_p12 = scmp.ne.s32.totalorder %s2367_s18, %s2092_s12  ;;  %s2097_s17 = sshll.u32 %s2183_s13, 4  ;;  %s2098_s17 = int_to_ptr.vmem [resolvable:$false] %s2097_s17 }
  0x55   : > { %s2099_s19 = scalar_lea.vmem %s2098_s17, 3072  ;;  %p2100_p4 = scmp.lt.s32.totalorder %s2367_s18, %s2098_s17 }
  0x56   : > { %p2095_p1 = pnand %p2093_p12, %p2079_p0  ;;  %p2101_p13 = scmp.lt.s32.totalorder %s2099_s19, %s2092_s12 }
  0x58   : > { %p2096_p5 = pneg %p2095_p1  ;;  %p2102_p6 = por %p2101_p13, %p2100_p4 }
  0x5a   : > { %p2103_p10 = pnand %p2102_p6, %p2096_p5 }
  0x5c   : > { %2106 = shalt.err (!%p2103_p10)
}
  0x5d   : > { %s2736_s20 = smov 4   ;;  %s2737_s30 = smov 64  }
  0x5e   : > { %1928 = dma.hbm_to_vmem [thread:$0]  (!%p2358_p11), %s2365_s7, 1536, %s2367_s18, %s2369_s26, %s2737_s30, %s2737_s30, %s2736_s20  }
  0x5f   : > { %257 = sbr.rel (%p2262_p8) target bundleno = 697 (0x2b9), region = 44  ;;  %s2403_s10 = sand.u32 (!%p2262_p8), 1, %s2169_s22  }
  0x60   : > { %s1905_s15 = smul.u32 (!%p2262_p8), 96, %s2403_s10  ;;  %s260_s16 = scalar_lea.sflag (!%p2262_p8), [#allocation3], %s2403_s10 }
  0x61   : > { %p2738_p4 = scmp.ne.s32.totalorder (!%p2262_p8), %s2729_s27, 0 }
  0x62   : > { %s2407_s12 = scalar_lea.vmem (!%p2262_p8), [#allocation2], %s1905_s15 }
  0x66   : > { %2152 = dma.done.wait (%p2738_p4), %s260_s16, 1536  }
  0x67   : > { %2154 = vsyncadd (%p2738_p4), %s260_s16, 4294965760  ;;  %p2739_p5 = scmp.eq.s32.totalorder %s2243_s25, 0 }
  0x69   : > { %2156 = dma.done.wait (%p2739_p5), [#allocation6], 4096   ;;  %p2740_p8 = pmov %p2739_p5 }
  0x6a   : > { %v1977_v0 = vld [vmem:[#allocation5] sm:$0xff]   ;;  %v1978_v1 = vld [vmem:[#allocation5 + $0x8] sm:$0xff]   ;;  %v1979_v2 = vld [vmem:[#allocation5 + $0x10] sm:$0xff]   ;;  %vm358_vm0 = vsmask.f32 3328  ;;  %vm972_vm2 = vcmask 1042432  }
  0x6b   : > { %2158 = vsyncadd (%p2740_p8), [#allocation6], 4294963200  ;;  %1787 = vmatprep.subr.bf16.mxu0 %v1977_v0  ;;  %v1980_v3 = vld [vmem:[#allocation5 + $0x18] sm:$0xff]   ;;  %v1985_v4 = vld [vmem:[#allocation5 + $0x40] sm:$0xff]   ;;  %vm359_vm1 = vsmask.f32 7440 }
  0x6c   : > { %1788 = vmatpush3.bf16.msra.mxu0 %v1977_v0  ;;  %v1986_v5 = vld [vmem:[%s2407_s12] sm:$0xff]   ;;  %1755 = vmatprep.subr.bf16.mxu1 %v1985_v4  ;;  %v1989_v7 = vld [vmem:[#allocation5 + $0x48] sm:$0xff]   ;;  %v1991_v8 = vld [vmem:[#allocation5 + $0x50] sm:$0xff]   ;;  %vm973_vm3 = vcmask 1046532   ;;  %vm2185_vm6 = vmmov 0   ;;  %vm1401_vm7 = vcmask 1041409  }
  0x6d   : > { %1789 = vmatprep.subr.bf16.mxu0 %v1978_v1  ;;  %v1981_v6 = vld [vmem:[#allocation5 + $0x20] sm:$0xff]   ;;  %1756 = vmatpush3.bf16.msra.mxu1 %v1985_v4  ;;  %v1982_v9 = vld [vmem:[#allocation5 + $0x28] sm:$0xff]   ;;  %v1995_v10 = vld [vmem:[#allocation5 + $0x58] sm:$0xff]   ;;  %vm1403_vm8 = vcmask 1042434   ;;  %vm1405_vm9 = vcmask 1043459   ;;  %vm1407_vm10 = vcmask 1044484  }
  0x6e   : > { %1803 = vmatprep.mubr.bf16.mxu0 %v1986_v5  ;;  %1757 = vmatprep.subr.bf16.mxu1 %v1989_v7  ;;  %v1983_v11 = vld [vmem:[#allocation5 + $0x30] sm:$0xff]   ;;  %v1997_v12 = vld [vmem:[#allocation5 + $0x60] sm:$0xff]   ;;  %v1984_v13 = vld [vmem:[#allocation5 + $0x38] sm:$0xff]   ;;  %vm1409_vm11 = vcmask 1045509   ;;  %vm1411_vm12 = vcmask 1046534   ;;  %vm1413_vm13 = vcmask 1047559  }
  0x6f   : > { %v2001_v14 = vld [vmem:[#allocation5 + $0x68] sm:$0xff]   ;;  %v1988_v15 = vld [vmem:[#allocation5 + $0x80] sm:$0xff]   ;;  %v2003_v16 = vld [vmem:[#allocation5 + $0x70] sm:$0xff]   ;;  %s1626_s19 = sshll.u32 %s2403_s10, 3  ;;  %s1695_s20 = sshll.u32 %s2243_s25, 7 }
  0x70   : > { %1790 = vmatpush3.bf16.msra.mxu0 %v1978_v1  ;;  %v1987_v17 = vld [vmem:[%s2407_s12 + $0xc] sm:$0xff]   ;;  %v1992_v19 = vld [vmem:[%s2407_s12 + $0x18] sm:$0xff]   ;;  %v334_v21 = vld [vmem:[%s2407_s12] sm:$0xf]  ;;  %s299_s30 = scalar_lea.vmem [#allocation8], %s1626_s19  ;;  %s2673_s27 = scalar_lea.hbm %s2723_s6, %s1695_s20 }
  0x71   : > { %1791 = vmatprep.subr.bf16.mxu0 %v1979_v2  ;;  %1758 = vmatpush3.bf16.msra.mxu1 %v1989_v7  ;;  %v1990_v18 = vld [vmem:[#allocation5 + $0x88] sm:$0xff]   ;;  %v2007_v20 = vld [vmem:[#allocation5 + $0x78] sm:$0xff]   ;;  %v2422_v22 = vld [vmem:[%s2407_s12 + $0x4] sm:$0xf]  ;;  %v362_v24 = vshrl.u32 %v334_v21, 16  ;;  %v365_v25 = vshll.u32 %v334_v21, 16 }
  0x72   : > { %1759 = vmatprep.subr.bf16.mxu1 %v1991_v8  ;;  %v2425_v23 = vld [vmem:[%s2407_s12 + $0x8] sm:$0x1]  ;;  %v371_v26 = vshll.u32 %v2422_v22, 16  ;;  %v375_v27 = vshrl.u32 %v2422_v22, 16  ;;  %v337_v28 = vld [vmem:[%s2407_s12 + $0xc] sm:$0xf]  ;;  %vm2446_vm4 = vmor %vm358_vm0, %vm359_vm1 }
  0x73   : > { %v381_v29 = vshll.u32 %v2425_v23, 16  ;;  %v980_v30 = vrot.slane %v2425_v23, 5  ;;  %v2433_v31 = vld [vmem:[%s2407_s12 + $0x10] sm:$0xf]  ;;  %v2436_v32 = vld [vmem:[%s2407_s12 + $0x14] sm:$0x1]  ;;  %vm2455_vm5 = vmor %vm972_vm2, %vm973_vm3 }
  0x74   : > { %1792 = vmatpush3.bf16.msra.mxu0 %v1979_v2  ;;  %v364_v33 = vrot.slane %v362_v24, 4  ;;  %v367_v34 = vrot.slane %v365_v25, 5  ;;  %v373_v35 = vrot.slane %v371_v26, 5  ;;  %v377_v36 = vrot.slane %v375_v27, 4  ;;  %v1994_v37 = vld [vmem:[#allocation5 + $0x90] sm:$0xff]   ;;  %v1993_v47 = vld [vmem:[%s2407_s12 + $0x24] sm:$0xff]  }
  0x75   : > { %1793 = vmatprep.subr.bf16.mxu0 %v1980_v3  ;;  %1760 = vmatpush3.bf16.msra.mxu1 %v1991_v8  ;;  %v383_v38 = vrot.slane %v381_v29, 5  ;;  %v386_v39 = vshrl.u32 %v337_v28, 16  ;;  %v389_v40 = vshll.u32 %v337_v28, 16  ;;  %v395_v41 = vshll.u32 %v2433_v31, 16  ;;  %v940_v46 = vld [vmem:[%s2407_s12] sm:$0xe] }
  0x76   : > { %1761 = vmatprep.subr.bf16.mxu1 %v1995_v10  ;;  %v368_v42 = vor.u32 %v367_v34, %v364_v33  ;;  %v378_v43 = vor.u32 %v377_v36, %v373_v35  ;;  %v399_v44 = vshrl.u32 %v2433_v31, 16  ;;  %v405_v45 = vshll.u32 %v2436_v32, 16  ;;  %v1998_v48 = vld [vmem:[%s2407_s12 + $0x30] sm:$0xff]   ;;  %v941_v58 = vld [vmem:[%s2407_s12 + $0xc] sm:$0xe]  ;;  %v1996_v59 = vld [vmem:[#allocation5 + $0x98] sm:$0xff]  }
  0x77   : > { %v388_v50 = vrot.slane %v386_v39, 4  ;;  %v391_v51 = vrot.slane %v389_v40, 5  ;;  %v397_v52 = vrot.slane %v395_v41, 5  ;;  %v984_v53 = vrot.slane %v2433_v31, 5  ;;  %v340_v1 = vld [vmem:[%s2407_s12 + $0x18] sm:$0xf] }
  0x78   : > { %1794 = vmatpush3.bf16.msra.mxu0 %v1980_v3  ;;  %v369_v54 = vrot.slane %v368_v42, 4  ;;  %v379_v55 = vrot.slane %v378_v43, 4  ;;  %v401_v56 = vrot.slane %v399_v44, 4  ;;  %v407_v57 = vrot.slane %v405_v45, 5  ;;  %v2496_v26 = vld [vmem:[%s2407_s12 + $0x28] sm:$0xf] }
  0x79   : > { %1795 = vmatprep.subr.bf16.mxu0 %v1981_v6  ;;  %1762 = vmatpush3.bf16.msra.mxu1 %v1995_v10  ;;  %v392_v60 = vor.u32 %v391_v51, %v388_v50  ;;  %v986_v61 = vrot.slane %v984_v53, 4  ;;  %v987_v62 = vrot.slane %v2436_v32, 5  ;;  %v1659_v0 = vrot.slane %v940_v46, 9  ;;  %v2000_v10 = vld [vmem:[#allocation5 + $0xa0] sm:$0xff]   ;;  %v2499_v27 = vld [vmem:[%s2407_s12 + $0x2c] sm:$0x1] }
  0x7a   : > { %1763 = vmatprep.subr.bf16.mxu1 %v1997_v12  ;;  %v374_v2 = vsel %vm2446_vm4, %v369_v54, %v373_v35  ;;  %v384_v3 = vsel %vm2446_vm4, %v379_v55, %v383_v38  ;;  %v402_v4 = vor.u32 %v401_v56, %v397_v52  ;;  %v977_v5 = vrot.slane %v2422_v22, 5  ;;  %v1999_v28 = vld [vmem:[%s2407_s12 + $0x3c] sm:$0xff]   ;;  %v942_v42 = vld [vmem:[%s2407_s12 + $0x18] sm:$0xe]  ;;  %v2011_v49 = vld [vmem:[#allocation7 + $0x10] sm:$0xff]   ;;  %s1526_s15 = sshll.u32 %s299_s30, 4  ;;  %s2675_s15 = int_to_ptr.vmem [resolvable:$true] %s1526_s15 }
  0x7b   : > { %v1627_v7 = vcombine.low %v374_v2, %v384_v3  ;;  %v393_v8 = vrot.slane %v392_v60, 4  ;;  %v443_v39 = vshll.u32 %v2496_v26, 16  ;;  %v447_v40 = vshrl.u32 %v2496_v26, 16  ;;  %v2014_v63 = vld [vmem:[#allocation7 + $0x28] sm:$0xff]   ;;  %s1513_s29 = scalar_lea.sflag [#allocation4], %s2403_s10  ;;  %s2107_s14 = scalar_lea.vmem %s2675_s15, 128 }
  0x7c   : > { %1796 = vmatpush3.bf16.msra.mxu0 %v1981_v6  ;;  %v2466_v6 = vld [vmem:[%s2407_s12 + $0x1c] sm:$0xf]  ;;  %v453_v41 = vshll.u32 %v2499_v27, 16  ;;  %v1661_v55 = vrot.slane %v942_v42, 9  ;;  %p2108_p11 = scmp.ne.s32.totalorder %s2675_s15, %s2107_s14  ;;  %p2745_p0 = scmp.ne.s32.totalorder %s2734_s9, 0 }
  0x7d   : > { %1797 = vmatprep.subr.bf16.mxu0 %v1982_v9  ;;  %1764 = vmatpush3.bf16.msra.mxu1 %v1997_v12  ;;  %v2470_v12 = vsel %vm2455_vm5, %v1659_v0, %v977_v5  ;;  %v423_v33 = vshrl.u32 %v2466_v6, 16  ;;  %v445_v50 = vrot.slane %v443_v39, 5  ;;  %v449_v51 = vrot.slane %v447_v40, 4  ;;  %v2005_v0 = vld [vmem:[%s2407_s12 + $0x54] sm:$0xff]   ;;  %v945_v39 = vld [vmem:[%s2407_s12 + $0x3c] sm:$0xe] }
  0x7e   : > { %1765 = vmatprep.subr.bf16.mxu1 %v2001_v14  ;;  %1771 = vmatprep.mubr.bf16.mxu1 %v1627_v7  ;;  %v991_v56 = vrot.slane %v2466_v6, 5  ;;  %v349_v7 = vld [vmem:[%s2407_s12 + $0x3c] sm:$0xf]  ;;  %p2109_p2 = pnand %p2108_p11, %p2745_p0  ;;  %s2186_s25 = smov [#allocation8]  }
  0x7f   : > { %v425_v43 = vrot.slane %v423_v33, 4  ;;  %v450_v60 = vor.u32 %v449_v51, %v445_v50  ;;  %s2111_s7 = sshll.u32 %s2186_s25, 4  ;;  %s2112_s7 = int_to_ptr.vmem [resolvable:$false] %s2111_s7 }
  0x80   : > { %1798 = vmatpush3.bf16.msra.mxu0 %v1982_v9  ;;  %v1660_v9 = vrot.slane %v941_v58, 9  ;;  %v2006_v58 = vld [vmem:[#allocation5 + $0xb0] sm:$0xff]   ;;  %v2520_v3 = vsel %vm2455_vm5, %v1661_v55, %v991_v56  ;;  %p2110_p3 = pneg %p2109_p2  ;;  %s2113_s18 = scalar_lea.vmem %s2112_s7, 256 }
  0x81   : > { %1799 = vmatprep.subr.bf16.mxu0 %v1983_v11  ;;  %1766 = vmatpush3.bf16.msra.mxu1 %v2001_v14  ;;  %v410_v14 = vshrl.u32 %v340_v1, 16  ;;  %p2114_p7 = scmp.lt.s32.totalorder %s2675_s15, %s2112_s7  ;;  %p2115_p9 = scmp.lt.s32.totalorder %s2113_s18, %s2107_s14 }
  0x82   : > { %1767 = vmatprep.subr.bf16.mxu1 %v2003_v16  ;;  %v2493_v24 = vsel %vm2455_vm5, %v1660_v9, %v984_v53  ;;  %v998_v9 = vrot.slane %v2496_v26, 5 }
  0x83   : > { %v412_v25 = vrot.slane %v410_v14, 4  ;;  %v2008_v14 = vld [vmem:[#allocation5 + $0xb8] sm:$0xff]   ;;  %p2116_p12 = por %p2115_p9, %p2114_p7 }
  0x84   : > { %1800 = vmatpush3.bf16.msra.mxu0 %v1983_v11  ;;  %v403_v11 = vrot.slane %v402_v4, 4  ;;  %v993_v4 = vrot.slane %v991_v56, 4 }
  0x85   : > { %1801 = vmatprep.subr.bf16.mxu0 %v1984_v13  ;;  %1768 = vmatpush3.bf16.msra.mxu1 %v2003_v16  ;;  %v2476_v16 = vsel %vm2455_vm5, %v986_v61, %v987_v62  ;;  %p2117_p1 = pnand %p2116_p12, %p2110_p3 }
  0x86   : > { %1769 = vmatprep.subr.bf16.mxu1 %v2007_v20  ;;  %v408_v21 = vsel %vm2446_vm4, %v403_v11, %v407_v57  ;;  %v346_v57 = vld [vmem:[%s2407_s12 + $0x30] sm:$0xf] }
  0x87   : > { %v458_v11 = vshrl.u32 %v346_v57, 16 }
  0x88   : > { %1802 = vmatpush3.bf16.msra.mxu0 %v1984_v13  ;;  %v979_v13 = vrot.slane %v977_v5, 4  ;;  %v2523_v5 = vld [vmem:[%s2407_s12 + $0x34] sm:$0xf] }
  0x89   : > { %1819 = vmatprep.subr.bf16.mxu0 %v1988_v15  ;;  %1770 = vmatpush3.bf16.msra.mxu1 %v2007_v20  ;;  %v343_v20 = vld [vmem:[%s2407_s12 + $0x24] sm:$0xf]  ;;  %v467_v33 = vshll.u32 %v2523_v5, 16 }
  0x8a   : > { %v2489_v22 = vsel %vm2455_vm5, %v979_v13, %v980_v30  ;;  %v2004_v30 = vld [vmem:[%s2407_s12 + $0x48] sm:$0xff]   ;;  %v434_v35 = vshrl.u32 %v343_v20, 16  ;;  %v437_v36 = vshll.u32 %v343_v20, 16  ;;  %v2532_v13 = vld [vmem:[%s2407_s12 + $0x40] sm:$0xf]  ;;  %v1668_v20 = vcombine.low %v2493_v24, %v2476_v16 }
  0x8b   : > { %1804 = vmatmul.mubr.bf16.vlgmr.msra.gmra.mrb[0].mxu0 %v1987_v17  ;;  %v2479_v17 = vld [vmem:[%s2407_s12 + $0x20] sm:$0x1]  ;;  %v1667_v31 = vcombine.low %v2470_v12, %v2489_v22  ;;  %v471_v16 = vshrl.u32 %v2523_v5, 16 }
  0x8c   : > { %1820 = vmatpush3.bf16.msra.mxu0 %v1988_v15  ;;  %1807 = vmatprep.mubr.bf16.mxu0 %v1992_v19  ;;  %v398_v15 = vsel %vm2446_vm4, %v393_v8, %v397_v52  ;;  %v419_v19 = vshll.u32 %v2466_v6, 16  ;;  %v429_v34 = vshll.u32 %v2479_v17, 16  ;;  %v436_v45 = vrot.slane %v434_v35, 4  ;;  %v2526_v6 = vld [vmem:[%s2407_s12 + $0x38] sm:$0x1] }
  0x8d   : > { %1821 = vmatprep.subr.bf16.mxu0 %v1990_v18  ;;  %v1628_v29 = vcombine.low %v398_v15, %v408_v21  ;;  %v439_v46 = vrot.slane %v437_v36, 5  ;;  %v455_v52 = vrot.slane %v453_v41, 5  ;;  %v994_v61 = vrot.slane %v2479_v17, 5 }
  0x8e   : > { %v421_v32 = vrot.slane %v419_v19, 5  ;;  %v431_v44 = vrot.slane %v429_v34, 5  ;;  %v451_v8 = vrot.slane %v450_v60, 4  ;;  %v461_v19 = vshll.u32 %v346_v57, 16 }
  0x8f   : > { %1772 = vmatmul.mubr.bf16.vlgmr.msra.gmra.mrb[0].mxu1 %v1628_v29  ;;  %v440_v54 = vor.u32 %v439_v46, %v436_v45  ;;  %v460_v29 = vrot.slane %v458_v11, 4  ;;  %v477_v24 = vshll.u32 %v2526_v6, 16  ;;  %v482_v34 = vshrl.u32 %v349_v7, 16  ;;  %v352_v45 = vld [vmem:[%s2407_s12 + $0x48] sm:$0xf] }
  0x90   : > { %1822 = vmatpush3.bf16.msra.mxu0 %v1990_v18  ;;  %v413_v18 = vshll.u32 %v340_v1, 16  ;;  %v426_v53 = vor.u32 %v425_v43, %v421_v32  ;;  %v469_v41 = vrot.slane %v467_v33, 5  ;;  %v473_v42 = vrot.slane %v471_v16, 4  ;;  %v946_v16 = vld [vmem:[%s2407_s12 + $0x48] sm:$0xe] }
  0x91   : > { %1823 = vmatprep.subr.bf16.mxu0 %v1994_v37  ;;  %v441_v2 = vrot.slane %v440_v54, 4  ;;  %v479_v12 = vrot.slane %v477_v24, 5  ;;  %v1008_v54 = vrot.slane %v2526_v6, 5 }
  0x92   : > { %v415_v23 = vrot.slane %v413_v18, 5  ;;  %v427_v1 = vrot.slane %v426_v53, 4  ;;  %v995_v18 = vsel %vm2455_vm5, %v993_v4, %v994_v61  ;;  %v474_v46 = vor.u32 %v473_v42, %v469_v41  ;;  %v2581_v4 = vld [vmem:[%s2407_s12 + $0x50] sm:$0x1] }
  0x93   : > { %1808 = vmatmul.mubr.bf16.gmra.mrb[4].mxu0 %v1993_v47  ;;  %v943_v47 = vld [vmem:[%s2407_s12 + $0x24] sm:$0xe]  ;;  %v446_v17 = vsel %vm2446_vm4, %v441_v2, %v445_v50  ;;  %v1669_v26 = vcombine.low %v2520_v3, %v995_v18  ;;  %v1005_v53 = vrot.slane %v2523_v5, 5  ;;  %v353_v3 = vld [vmem:[%s2407_s12 + $0x4c] sm:$0xf]  ;;  %v506_v5 = vshrl.u32 %v352_v45, 16 }
  0x94   : > { %1824 = vmatpush3.bf16.msra.mxu0 %v1994_v37  ;;  %1811 = vmatprep.mubr.bf16.mxu0 %v1998_v48  ;;  %v2002_v37 = vld [vmem:[#allocation5 + $0xa8] sm:$0xff]   ;;  %v416_v38 = vor.u32 %v415_v23, %v412_v25  ;;  %v1662_v62 = vrot.slane %v943_v47, 9  ;;  %v432_v15 = vsel %vm2446_vm4, %v427_v1, %v431_v44  ;;  %v456_v25 = vsel %vm2446_vm4, %v451_v8, %v455_v52 }
  0x95   : > { %1825 = vmatprep.subr.bf16.mxu0 %v1996_v59  ;;  %v463_v23 = vrot.slane %v461_v19, 5  ;;  %v495_v47 = vshrl.u32 %v2532_v13, 16  ;;  %v475_v56 = vrot.slane %v474_v46, 4  ;;  %v1007_v61 = vrot.slane %v1005_v53, 4  ;;  %v947_v46 = vld [vmem:[%s2407_s12 + $0x54] sm:$0xe] }
  0x96   : > { %v417_v48 = vrot.slane %v416_v38, 4  ;;  %v2557_v35 = vsel %vm2455_vm5, %v1662_v62, %v998_v9  ;;  %v491_v38 = vshll.u32 %v2532_v13, 16  ;;  %v1012_v62 = vrot.slane %v2532_v13, 5 }
  0x97   : > { %v464_v36 = vor.u32 %v463_v23, %v460_v29  ;;  %v497_v57 = vrot.slane %v495_v47, 4  ;;  %v1009_v8 = vsel %vm2455_vm5, %v1007_v61, %v1008_v54  ;;  %v515_v18 = vshll.u32 %v353_v3, 16 }
  0x98   : > { %1826 = vmatpush3.bf16.msra.mxu0 %v1996_v59  ;;  %v422_v59 = vsel %vm2446_vm4, %v417_v48, %v421_v32  ;;  %v2546_v32 = vld [vmem:[%s2407_s12 + $0x44] sm:$0x1]  ;;  %v493_v44 = vrot.slane %v491_v38, 5  ;;  %v519_v19 = vshrl.u32 %v353_v3, 16 }
  0x99   : > { %1827 = vmatprep.subr.bf16.mxu0 %v2000_v10  ;;  %v1629_v21 = vcombine.low %v422_v59, %v432_v15  ;;  %v465_v22 = vrot.slane %v464_v36, 4  ;;  %v501_v48 = vshll.u32 %v2546_v32, 16  ;;  %v508_v15 = vrot.slane %v506_v5, 4 }
  0x9a   : > { %v498_v1 = vor.u32 %v497_v57, %v493_v44  ;;  %v517_v33 = vrot.slane %v515_v18, 5  ;;  %v521_v24 = vrot.slane %v519_v19, 4 }
  0x9b   : > { %1812 = vmatmul.mubr.bf16.gmra.mrb[8].mxu0 %v1999_v28  ;;  %v1000_v28 = vrot.slane %v998_v9, 4  ;;  %1775 = vmatprep.mubr.bf16.mxu1 %v1629_v21  ;;  %v470_v55 = vsel %vm2446_vm4, %v465_v22, %v469_v41  ;;  %v503_v60 = vrot.slane %v501_v48, 5  ;;  %v1015_v9 = vrot.slane %v2546_v32, 5 }
  0x9c   : > { %1828 = vmatpush3.bf16.msra.mxu0 %v2000_v10  ;;  %1815 = vmatprep.mubr.bf16.mxu0 %v2004_v30  ;;  %v1001_v10 = vrot.slane %v2499_v27, 5  ;;  %v1630_v27 = vcombine.low %v446_v17, %v456_v25  ;;  %v944_v30 = vld [vmem:[%s2407_s12 + $0x30] sm:$0xe]  ;;  %v499_v11 = vrot.slane %v498_v1, 4  ;;  %v509_v17 = vshll.u32 %v352_v45, 16 }
  0x9d   : > { %1829 = vmatprep.subr.bf16.mxu0 %v2002_v37  ;;  %v1663_v50 = vrot.slane %v944_v30, 9  ;;  %v522_v41 = vor.u32 %v521_v24, %v517_v33  ;;  %v1019_v22 = vrot.slane %v353_v3, 5 }
  0x9e   : > { %1776 = vmatmul.mubr.bf16.gmra.mrb[4].mxu1 %v1630_v27  ;;  %v2563_v40 = vsel %vm2455_vm5, %v1000_v28, %v1001_v10  ;;  %v355_v10 = vld [vmem:[%s2407_s12 + $0x54] sm:$0xf]  ;;  %v504_v21 = vsel %vm2446_vm4, %v499_v11, %v503_v60  ;;  %v357_v27 = vld [vmem:[%s2407_s12 + $0x5c] sm:$0x1]  ;;  %v511_v30 = vrot.slane %v509_v17, 5 }
  0x9f   : > { %v1670_v51 = vcombine.low %v2557_v35, %v2563_v40  ;;  %v1006_v2 = vsel %vm2455_vm5, %v1663_v50, %v1005_v53  ;;  %v530_v28 = vshrl.u32 %v355_v10, 16  ;;  %v533_v29 = vshll.u32 %v355_v10, 16  ;;  %v2010_v10 = vld [vmem:[#allocation7 + $0x8] sm:$0xff]   ;;  %v2012_v11 = vld [vmem:[#allocation7 + $0x18] sm:$0xff]  }
  0xa0   : > { %1830 = vmatpush3.bf16.msra.mxu0 %v2002_v37  ;;  %v485_v37 = vshll.u32 %v349_v7, 16  ;;  %v1671_v25 = vcombine.low %v1006_v2, %v1009_v8  ;;  %v549_v40 = vshll.u32 %v357_v27, 16  ;;  %v523_v47 = vrot.slane %v522_v41, 4  ;;  %v2633_v41 = vld [vmem:[%s2722_s5 + $0x8] sm:$0xff] }
  0xa1   : > { %1831 = vmatprep.subr.bf16.mxu0 %v2006_v58  ;;  %v532_v35 = vrot.slane %v530_v28, 4  ;;  %v535_v36 = vrot.slane %v533_v29, 5  ;;  %v2184_v8 = vmov 0.0   ;;  %v2620_v29 = vld [vmem:[%s2719_s2] ss:$0 sm:$0xff] }
  0xa2   : > { %v487_v43 = vrot.slane %v485_v37, 5  ;;  %v512_v37 = vor.u32 %v511_v30, %v508_v15  ;;  %v551_v50 = vrot.slane %v549_v40, 5  ;;  %1851 = vmatprep.subr.bf16.mxu1 %v2184_v8  ;;  %v2016_v15 = vld [vmem:[#allocation7 + $0x38] sm:$0xff]  }
  0xa3   : > { %1816 = vmatmul.mubr.bf16.gmra.mrb[12].mxu0 %v2005_v0  ;;  %v480_v0 = vsel %vm2446_vm4, %v475_v56, %v479_v12  ;;  %v536_v42 = vor.u32 %v535_v36, %v532_v35  ;;  %v1665_v12 = vrot.slane %v946_v16, 9 }
  0xa4   : > { %1832 = vmatpush3.bf16.msra.mxu0 %v2006_v58  ;;  %1835 = vmatprep.mubr.bf16.mxu0 %v1667_v31  ;;  %v484_v31 = vrot.slane %v482_v34, 4  ;;  %v1664_v58 = vrot.slane %v945_v39, 9  ;;  %v1631_v6 = vcombine.low %v470_v55, %v480_v0  ;;  %v1022_v55 = vrot.slane %v2581_v4, 5 }
  0xa5   : > { %1833 = vmatprep.subr.bf16.mxu0 %v2008_v14  ;;  %v537_v48 = vrot.slane %v536_v42, 4  ;;  %v1029_v0 = vrot.slane %v357_v27, 5 }
  0xa6   : > { %v488_v52 = vor.u32 %v487_v43, %v484_v31  ;;  %v1013_v13 = vsel %vm2455_vm5, %v1664_v58, %v1012_v62  ;;  %1779 = vmatprep.mubr.bf16.mxu1 %v1631_v6  ;;  %v513_v43 = vrot.slane %v512_v37, 4  ;;  %v1666_v58 = vrot.slane %v947_v46, 9 }
  0xa8   : > { %1834 = vmatpush3.bf16.msra.mxu0 %v2008_v14  ;;  %v489_v59 = vrot.slane %v488_v52, 4  ;;  %v1014_v14 = vrot.slane %v1012_v62, 4  ;;  %v1021_v52 = vrot.slane %v1019_v22, 4  ;;  %v518_v53 = vsel %vm2446_vm4, %v513_v43, %v517_v33 }
  0xaa   : > { %v494_v7 = vsel %vm2446_vm4, %v489_v59, %v493_v44  ;;  %v1016_v32 = vsel %vm2455_vm5, %v1014_v14, %v1015_v9  ;;  %v1023_v62 = vsel %vm2455_vm5, %v1021_v52, %v1022_v55  ;;  %v2009_v9 = vld [vmem:[#allocation7] sm:$0xff]   ;;  %v2015_v14 = vld [vmem:[#allocation7 + $0x30] sm:$0xff]  }
  0xab   : > { %1836 = vmatmul.mubr.bf16.vlgmr.msra.gmra.mrb[0].mxu0 %v1668_v20  ;;  %v525_v20 = vshll.u32 %v2581_v4, 16  ;;  %v1632_v23 = vcombine.low %v494_v7, %v504_v21  ;;  %v1672_v31 = vcombine.low %v1013_v13, %v1016_v32  ;;  %1852 = vmatpush3.bf16.msra.mxu1 %v2009_v9  ;;  %v2013_v13 = vld [vmem:[#allocation7 + $0x20] sm:$0xff]  }
  0xac   : > { %1839 = vmatprep.mubr.bf16.mxu0 %v1669_v26  ;;  %v356_v26 = vld [vmem:[%s2407_s12 + $0x58] sm:$0xf]  ;;  %1853 = vmatprep.subr.bf16.mxu1 %v2184_v8 }
  0xad   : > { %v527_v34 = vrot.slane %v525_v20, 5  ;;  %1780 = vmatmul.mubr.bf16.gmra.mrb[8].mxu1 %v1632_v23  ;;  %v539_v38 = vshll.u32 %v356_v26, 16  ;;  %v543_v39 = vshrl.u32 %v356_v26, 16  ;;  %v1026_v59 = vrot.slane %v356_v26, 5 }
  0xaf   : > { %v541_v44 = vrot.slane %v539_v38, 5  ;;  %v545_v45 = vrot.slane %v543_v39, 4  ;;  %v528_v56 = vsel %vm2446_vm4, %v523_v47, %v527_v34  ;;  %v1028_v2 = vrot.slane %v1026_v59, 4  ;;  %1854 = vmatpush3.bf16.msra.mxu1 %v2010_v10  ;;  %v2628_v39 = vld [vmem:[%s2722_s5] sm:$0xff] }
  0xb0   : > { %v1633_v60 = vcombine.low %v518_v53, %v528_v56  ;;  %v1027_v5 = vsel %vm2455_vm5, %v1666_v58, %v1026_v59  ;;  %1855 = vmatprep.subr.bf16.mxu1 %v2184_v8 }
  0xb1   : > { %v546_v54 = vor.u32 %v545_v45, %v541_v44  ;;  %v542_v57 = vsel %vm2446_vm4, %v537_v48, %v541_v44  ;;  %v1030_v6 = vsel %vm2455_vm5, %v1028_v2, %v1029_v0 }
  0xb2   : > { %1783 = vmatprep.mubr.bf16.mxu1 %v1633_v60  ;;  %v1674_v7 = vcombine.low %v1027_v5, %v1030_v6 }
  0xb3   : > { %1840 = vmatmul.mubr.bf16.gmra.mrb[4].mxu0 %v1670_v51  ;;  %v1020_v51 = vsel %vm2455_vm5, %v1665_v12, %v1019_v22  ;;  %v547_v61 = vrot.slane %v546_v54, 4  ;;  %1856 = vmatpush3.bf16.msra.mxu1 %v2011_v49 }
  0xb4   : > { %1843 = vmatprep.mubr.bf16.mxu0 %v1671_v25  ;;  %v1673_v1 = vcombine.low %v1020_v51, %v1023_v62  ;;  %1857 = vmatprep.subr.bf16.mxu1 %v2184_v8 }
  0xb5   : > { %v552_v3 = vsel %vm2446_vm4, %v547_v61, %v551_v50 }
  0xb6   : > { %v1634_v4 = vcombine.low %v542_v57, %v552_v3 }
  0xb7   : > { %1858 = vmatpush3.bf16.msra.mxu1 %v2012_v11 }
  0xb8   : > { %1784 = vmatmul.mubr.bf16.gmra.mrb[12].mxu1 %v1634_v4  ;;  %1859 = vmatprep.subr.bf16.mxu1 %v2184_v8 }
  0xb9   : > { %1867 = vmatprep.mubr.msk.bf16.mxu1 %vm2185_vm6, %v2184_v8 }
  0xbb   : > { %1844 = vmatmul.mubr.bf16.gmra.mrb[8].mxu0 %v1672_v31  ;;  %1860 = vmatpush3.bf16.msra.mxu1 %v2013_v13 }
  0xbc   : > { %1847 = vmatprep.mubr.bf16.mxu0 %v1673_v1  ;;  %1861 = vmatprep.subr.bf16.mxu1 %v2184_v8 }
  0xbf   : > { %1862 = vmatpush3.bf16.msra.mxu1 %v2014_v63 }
  0xc0   : > { %1863 = vmatprep.subr.bf16.mxu1 %v2184_v8 }
  0xc3   : > { %1848 = vmatmul.mubr.bf16.gmra.mrb[12].mxu0 %v1674_v7  ;;  %1864 = vmatpush3.bf16.msra.mxu1 %v2015_v14 }
  0xc4   : > { %1865 = vmatprep.subr.bf16.mxu1 %v2184_v8 }
  0xc7   : > { %1866 = vmatpush3.bf16.msra.mxu1 %v2016_v15 }
 0x162   : > { %v1773_v17 = vpop.f32.mrb[0].mxu1 }
 0x163   : > { %v684_v18 = vpop.f32.mrb[1].mxu1 }
 0x164   : > { %v1774_v19 = vpop.f32.mrb[2].mxu1 }
 0x165   : > { %v687_v20 = vpop.f32.mrb[3].mxu1 }
 0x171   : > { %v1777_v21 = vpop.f32.mrb[4].mxu1 }
 0x172   : > { %v700_v25 = vpop.f32.mrb[5].mxu1 }
 0x173   : > { %v1778_v26 = vpop.f32.mrb[6].mxu1 }
 0x174   : > { %v703_v27 = vpop.f32.mrb[7].mxu1 }
 0x17e   : > { %v1837_v28 = vpop.f32.mrb[0].mxu0 }
 0x17f   : > { %v1871_v23 = vadd.f32 %v1837_v28, %v1773_v17  ;;  %v1162_v32 = vpop.f32.mrb[1].mxu0 }
 0x180   : > { %v1872_v30 = vadd.f32 %v1162_v32, %v684_v18  ;;  %v1838_v33 = vpop.f32.mrb[2].mxu0  ;;  %v1781_v22 = vpop.f32.mrb[8].mxu1 }
 0x181   : > { %v1250_v16 = vadd.f32 %v1871_v23, %v2620_v29  ;;  %v1873_v24 = vadd.f32 %v1838_v33, %v1774_v19  ;;  %v1165_v34 = vpop.f32.mrb[3].mxu0  ;;  %v716_v44 = vpop.f32.mrb[9].mxu1 }
 0x182   : > { %v1248_v35 = vadd.f32 %v1872_v30, %v2620_v29  ;;  %v1874_v36 = vadd.f32 %v1165_v34, %v687_v20  ;;  %v1782_v50 = vpop.f32.mrb[10].mxu1 }
 0x183   : > { %v1266_v37 = vmax.f32 %v1250_v16, 0.0  ;;  %v1251_v38 = vadd.f32 %v1873_v24, %v2620_v29  ;;  %v719_v55 = vpop.f32.mrb[11].mxu1 }
 0x184   : > { %v1264_v40 = vmax.f32 %v1248_v35, 0.0  ;;  %v1249_v42 = vadd.f32 %v1874_v36, %v2620_v29 }
 0x185   : > { %v1267_v12 = vmax.f32 %v1251_v38, 0.0  ;;  %v1284_v45 = vmul.f32 %v2628_v39, %v1266_v37 }
 0x186   : > { %v1265_v31 = vmax.f32 %v1249_v42, 0.0  ;;  %v1841_v43 = vpop.f32.mrb[4].mxu0  ;;  %v1282_v52 = vmul.f32 %v2628_v39, %v1264_v40 }
 0x187   : > { %v1285_v46 = vmul.f32 %v2633_v41, %v1267_v12  ;;  %v1875_v47 = vadd.f32 %v1841_v43, %v1777_v21  ;;  %v1178_v48 = vpop.f32.mrb[5].mxu0 }
 0x188   : > { %v1283_v53 = vmul.f32 %v2633_v41, %v1265_v31  ;;  %v1876_v54 = vadd.f32 %v1178_v48, %v700_v25  ;;  %v1842_v51 = vpop.f32.mrb[6].mxu0 }
 0x189   : > { %v1305_v56 = vmax.f32 %v1284_v45, %v1285_v46  ;;  %v1254_v57 = vadd.f32 %v1875_v47, %v2620_v29  ;;  %v1877_v58 = vadd.f32 %v1842_v51, %v1778_v26  ;;  %v1181_v59 = vpop.f32.mrb[7].mxu0 }
 0x18a   : > { %v1298_v60 = vmax.f32 %v1282_v52, %v1283_v53  ;;  %v1252_v61 = vadd.f32 %v1876_v54, %v2620_v29  ;;  %v1878_v62 = vadd.f32 %v1181_v59, %v703_v27 }
 0x18b   : > { %v1306_v0 = vrot.slane %v1305_v56, 4  ;;  %v1270_v1 = vmax.f32 %v1254_v57, 0.0  ;;  %v1255_v2 = vadd.f32 %v1877_v58, %v2620_v29  ;;  %v1785_v21 = vpop.f32.mrb[12].mxu1 }
 0x18c   : > { %v1299_v3 = vrot.slane %v1298_v60, 4  ;;  %v1268_v4 = vmax.f32 %v1252_v61, 0.0  ;;  %v1253_v5 = vadd.f32 %v1878_v62, %v2620_v29  ;;  %v732_v32 = vpop.f32.mrb[13].mxu1 }
 0x18d   : > { %v1307_v6 = vmax.f32 %v1305_v56, %v1306_v0  ;;  %v1271_v7 = vmax.f32 %v1255_v2, 0.0  ;;  %v1288_v11 = vmul.f32 %v2628_v39, %v1270_v1  ;;  %v1786_v34 = vpop.f32.mrb[14].mxu1 }
 0x18e   : > { %v1300_v8 = vmax.f32 %v1298_v60, %v1299_v3  ;;  %v1269_v9 = vmax.f32 %v1253_v5, 0.0  ;;  %v1845_v10 = vpop.f32.mrb[8].mxu0  ;;  %v1286_v17 = vmul.f32 %v2628_v39, %v1268_v4  ;;  %v735_v40 = vpop.f32.mrb[15].mxu1 }
 0x18f   : > { %v1308_v49 = vrot.slane %v1307_v6, 2  ;;  %v1289_v13 = vmul.f32 %v2633_v41, %v1271_v7  ;;  %v1879_v63 = vadd.f32 %v1845_v10, %v1781_v22  ;;  %v1194_v14 = vpop.f32.mrb[9].mxu0 }
 0x190   : > { %v1301_v15 = vrot.slane %v1300_v8, 2  ;;  %v1287_v18 = vmul.f32 %v2633_v41, %v1269_v9  ;;  %v1880_v19 = vadd.f32 %v1194_v14, %v716_v44  ;;  %v1846_v20 = vpop.f32.mrb[10].mxu0 }
 0x191   : > { %v1309_v25 = vmax.f32 %v1307_v6, %v1308_v49  ;;  %v1319_v26 = vmax.f32 %v1288_v11, %v1289_v13  ;;  %v1258_v27 = vadd.f32 %v1879_v63, %v2620_v29  ;;  %v1881_v28 = vadd.f32 %v1846_v20, %v1782_v50  ;;  %v1197_v23 = vpop.f32.mrb[11].mxu0 }
 0x192   : > { %v1302_v30 = vmax.f32 %v1300_v8, %v1301_v15  ;;  %v1312_v33 = vmax.f32 %v1286_v17, %v1287_v18  ;;  %v1256_v16 = vadd.f32 %v1880_v19, %v2620_v29  ;;  %v1882_v24 = vadd.f32 %v1197_v23, %v719_v55 }
 0x193   : > { %v1310_v35 = vrot.slane %v1309_v25, 1  ;;  %v1320_v36 = vrot.slane %v1319_v26, 4  ;;  %v1274_v37 = vmax.f32 %v1258_v27, 0.0  ;;  %v1259_v38 = vadd.f32 %v1881_v28, %v2620_v29 }
 0x194   : > { %v1303_v42 = vrot.slane %v1302_v30, 1  ;;  %v1313_v12 = vrot.slane %v1312_v33, 4  ;;  %v1272_v22 = vmax.f32 %v1256_v16, 0.0  ;;  %v1257_v31 = vadd.f32 %v1882_v24, %v2620_v29 }
 0x195   : > { %v1311_v43 = vmax.f32 %v1309_v25, %v1310_v35  ;;  %v1321_v44 = vmax.f32 %v1319_v26, %v1320_v36  ;;  %v1292_v45 = vmul.f32 %v2628_v39, %v1274_v37  ;;  %v1275_v46 = vmax.f32 %v1259_v38, 0.0 }
 0x196   : > { %v1304_v47 = vmax.f32 %v1302_v30, %v1303_v42  ;;  %v1314_v48 = vmax.f32 %v1312_v33, %v1313_v12  ;;  %v1290_v50 = vmul.f32 %v2628_v39, %v1272_v22  ;;  %v1273_v52 = vmax.f32 %v1257_v31, 0.0  ;;  %v1849_v53 = vpop.f32.mrb[12].mxu0 }
 0x197   : > { %v1355_v54 = vpack.c.bf16 %v1311_v43, %v1311_v43  ;;  %v1322_v51 = vrot.slane %v1321_v44, 2  ;;  %v1293_v55 = vmul.f32 %v2633_v41, %v1275_v46  ;;  %v1883_v56 = vadd.f32 %v1849_v53, %v1785_v21  ;;  %v1210_v57 = vpop.f32.mrb[13].mxu0 }
 0x198   : > { %v1354_v58 = vpack.c.bf16 %v1304_v47, %v1304_v47  ;;  %v1315_v59 = vrot.slane %v1314_v48, 2  ;;  %v1291_v60 = vmul.f32 %v2633_v41, %v1273_v52  ;;  %v1884_v61 = vadd.f32 %v1210_v57, %v732_v32  ;;  %v1850_v62 = vpop.f32.mrb[14].mxu0 }
 0x199   : > { %v1394_v0 = vunpack.c.l.b16 %v1355_v54  ;;  %v1323_v1 = vmax.f32 %v1321_v44, %v1322_v51  ;;  %v1333_v2 = vmax.f32 %v1292_v45, %v1293_v55  ;;  %v1262_v3 = vadd.f32 %v1883_v56, %v2620_v29  ;;  %v1213_v4 = vpop.f32.mrb[15].mxu0 }
 0x19a   : > { %v1393_v5 = vunpack.c.l.b16 %v1354_v58  ;;  %v1316_v6 = vmax.f32 %v1314_v48, %v1315_v59  ;;  %v1326_v7 = vmax.f32 %v1290_v50, %v1291_v60  ;;  %v1885_v10 = vadd.f32 %v1850_v62, %v1786_v34 }
 0x19b   : > { %v1324_v8 = vrot.slane %v1323_v1, 1  ;;  %v1334_v9 = vrot.slane %v1333_v2, 4  ;;  %v1260_v63 = vadd.f32 %v1884_v61, %v2620_v29  ;;  %v1278_v17 = vmax.f32 %v1262_v3, 0.0 }
 0x19c   : > { %v1402_v49 = vsel %vm1401_vm7, %v1394_v0, %v1393_v5  ;;  %v1317_v11 = vrot.slane %v1316_v6, 1  ;;  %v1327_v13 = vrot.slane %v1326_v7, 4  ;;  %v1263_v18 = vadd.f32 %v1885_v10, %v2620_v29 }
 0x19d   : > { %v1325_v14 = vmax.f32 %v1323_v1, %v1324_v8  ;;  %v1335_v15 = vmax.f32 %v1333_v2, %v1334_v9  ;;  %v1886_v21 = vadd.f32 %v1213_v4, %v735_v40  ;;  %v1276_v32 = vmax.f32 %v1260_v63, 0.0 }
 0x19e   : > { %v1318_v19 = vmax.f32 %v1316_v6, %v1317_v11  ;;  %v1328_v20 = vmax.f32 %v1326_v7, %v1327_v13  ;;  %v1279_v27 = vmax.f32 %v1263_v18, 0.0  ;;  %v1296_v16 = vmul.f32 %v2628_v39, %v1278_v17  ;;  %v1684_v7 = vld [vmem:[%s2721_s4] ss:$0 sm:$0xff] }
 0x19f   : > { %v1357_v25 = vpack.c.bf16 %v1325_v14, %v1325_v14  ;;  %v1336_v26 = vrot.slane %v1335_v15, 2  ;;  %v1261_v30 = vadd.f32 %v1886_v21, %v2620_v29  ;;  %v1294_v22 = vmul.f32 %v2628_v39, %v1276_v32 }
 0x1a0   : > { %v1356_v28 = vpack.c.bf16 %v1318_v19, %v1318_v19  ;;  %v1329_v23 = vrot.slane %v1328_v20, 2  ;;  %v1297_v24 = vmul.f32 %v2633_v41, %v1279_v27 }
 0x1a1   : > { %v1337_v33 = vmax.f32 %v1335_v15, %v1336_v26  ;;  %v1277_v36 = vmax.f32 %v1261_v30, 0.0  ;;  %v1396_v37 = vunpack.c.l.b16 %v1357_v25 }
 0x1a2   : > { %v1395_v34 = vunpack.c.l.b16 %v1356_v28  ;;  %v1330_v35 = vmax.f32 %v1328_v20, %v1329_v23  ;;  %v1347_v40 = vmax.f32 %v1296_v16, %v1297_v24 }
 0x1a3   : > { %v1338_v38 = vrot.slane %v1337_v33, 1  ;;  %v1295_v31 = vmul.f32 %v2633_v41, %v1277_v36 }
 0x1a4   : > { %v1404_v42 = vsel %vm1403_vm8, %v1395_v34, %v1402_v49  ;;  %v1331_v12 = vrot.slane %v1330_v35, 1  ;;  %v1348_v44 = vrot.slane %v1347_v40, 4 }
 0x1a5   : > { %v1339_v29 = vmax.f32 %v1337_v33, %v1338_v38  ;;  %v1406_v43 = vsel %vm1405_vm9, %v1396_v37, %v1404_v42  ;;  %v1340_v46 = vmax.f32 %v1294_v22, %v1295_v31 }
 0x1a6   : > { %v1332_v45 = vmax.f32 %v1330_v35, %v1331_v12  ;;  %v1349_v48 = vmax.f32 %v1347_v40, %v1348_v44 }
 0x1a7   : > { %v1359_v47 = vpack.c.bf16 %v1339_v29, %v1339_v29  ;;  %v1341_v52 = vrot.slane %v1340_v46, 4 }
 0x1a8   : > { %v1358_v50 = vpack.c.bf16 %v1332_v45, %v1332_v45  ;;  %v1350_v53 = vrot.slane %v1349_v48, 2 }
 0x1a9   : > { %v1342_v51 = vmax.f32 %v1340_v46, %v1341_v52  ;;  %v1398_v55 = vunpack.c.l.b16 %v1359_v47 }
 0x1aa   : > { %v1397_v54 = vunpack.c.l.b16 %v1358_v50  ;;  %v1351_v56 = vmax.f32 %v1349_v48, %v1350_v53 }
 0x1ab   : > { %v1343_v39 = vrot.slane %v1342_v51, 2 }
 0x1ac   : > { %v1408_v57 = vsel %vm1407_vm10, %v1397_v54, %v1406_v43  ;;  %v1352_v58 = vrot.slane %v1351_v56, 1 }
 0x1ad   : > { %v1410_v41 = vsel %vm1409_vm11, %v1398_v55, %v1408_v57  ;;  %v1344_v59 = vmax.f32 %v1342_v51, %v1343_v39 }
 0x1ae   : > { %v1353_v60 = vmax.f32 %v1351_v56, %v1352_v58 }
 0x1af   : > { %v1345_v61 = vrot.slane %v1344_v59, 1 }
 0x1b0   : > { %v1361_v0 = vpack.c.bf16 %v1353_v60, %v1353_v60 }
 0x1b1   : > { %v1346_v62 = vmax.f32 %v1344_v59, %v1345_v61 }
 0x1b2   : > { %v1400_v3 = vunpack.c.l.b16 %v1361_v0 }
 0x1b3   : > { %v1360_v1 = vpack.c.bf16 %v1346_v62, %v1346_v62 }
 0x1b5   : > { %v1399_v2 = vunpack.c.l.b16 %v1360_v1 }
 0x1b7   : > { %v1412_v4 = vsel %vm1411_vm12, %v1399_v2, %v1410_v41 }
 0x1b8   : > { %v1414_v5 = vsel %vm1413_vm13, %v1400_v3, %v1412_v4 }
 0x1b9   : > { %v1415_v6 = vpack.c.b16 %v1414_v5, %v1414_v5 }
 0x1bb   : > { %1868 = vmatmul.mubr.bf16.vlgmr.msra.gmra.mrb[16].mxu1 %v1415_v6 }
 0x28e   : > { %v1499_v8 = vpop.f32.mrb[16].mxu1 }
 0x28f   : > { %v1500_v9 = vadd.f32 %v1684_v7, %v1499_v8  ;;  %v1869_v10 = vpop.f32.mrb[17].mxu1 }
 0x290   : > { %v1502_v49 = vpop.f32.mrb[18].mxu1 }
 0x291   : > { %v1693_v11 = vmul.f32 -1.442695, %v1500_v9  ;;  %v1870_v13 = vpop.f32.mrb[19].mxu1 }
 0x293   : > { %2017 = vpow2.f32 %v1693_v11 }
 0x29d   : > { %v2018_v63 = vpop.eup %2017 }
 0x29e   : > { %v1508_v14 = vadd.f32 1.0, %v2018_v63 }
 0x2a0   : > { %2019 = vrcp.f32 %v1508_v14 }
 0x2aa   : > { %v2020_v15 = vpop.eup %2019 }
 0x2ab   : > { %1511 = vst [vmem:[%s299_s30] sm:$0xff] %v2020_v15 }
 0x2ac   : > { %2120 = shalt.err (!%p2117_p1)
}
 0x2ad   : > { %s2121_s10 = scalar_lea.hbm %s2673_s27, 128  ;;  %s2125_s17 = scalar_lea.hbm %s2723_s6, 256 }
 0x2ae   : > { %p2122_p13 = scmp.ne.s32.totalorder %s2673_s27, %s2121_s10  ;;  %p2126_p4 = scmp.lt.u32.totalorder %s2673_s27, %s2723_s6 }
 0x2af   : > { %p2127_p5 = scmp.lt.u32.totalorder %s2125_s17, %s2121_s10  ;;  %p2129_p11 = scmp.lt.u32.totalorder %s2121_s10, %s2673_s27 }
 0x2b0   : > { %p2123_p6 = pnand %p2122_p13, %p2745_p0 }
 0x2b1   : > { %p2128_p8 = por %p2127_p5, %p2126_p4 }
 0x2b2   : > { %p2124_p10 = pneg %p2123_p6 }
 0x2b3   : > { %p2130_p2 = por %p2129_p11, %p2128_p8 }
 0x2b5   : > { %p2131_p3 = pnand %p2130_p2, %p2124_p10 }
 0x2b7   : > { %2134 = shalt.err (!%p2131_p3)
}
 0x2b8   : > { %1916 = dma.vmem_to_hbm [thread:$0]  (%p2745_p0), %s2675_s15, 128, %s2673_s27, %s1513_s29  }
 0x2b9 PF: > { %s1538_s30 = sand.u32 1, %s2165_s21   ;;  %p2746_p7 = scmp.ne.s32.totalorder %s2730_s28, 0 }
 0x2ba   : > { %p2747_p9 = scmp.ge.s32.totalorder %s2177_s24, 2  ;;  %s1539_s16 = scalar_lea.sflag [#allocation4], %s1538_s30 }
 0x2bc   : > { %p1930_p12 = pnand %p2747_p9, %p2746_p7 }
 0x2be   : > { %2160 = dma.done.wait (!%p1930_p12), %s1539_s16, 128  }
 0x2bf   : > { %2162 = vsyncadd (!%p1930_p12), %s1539_s16, 4294967168  ;;  %p20_p1 = scmp.ge.s32.totalorder %s2338_s8, 4   ;;  %s2748_s21 = smov %s2169_s22 }
 0x2c0   : > { %s2749_s22 = smov %s2173_s23  ;;  %s2750_s23 = smov %s2354_s11 }
 0x2c1   : > { %s2751_s24 = smov %s2338_s8  ;;  %22 = sbr.rel (!%p20_p1) target bundleno = 6 (0x6), region = 99 }
 0x2c8   :  { %1544 = vsyncpa [#allocation3], 1 }
 0x2c9   :  { %1546 = vsyncpa [#allocation3 + $0x1], 1 }
 0x2ca   :  { %1547 = vsyncpa [#allocation6], 1 }
 0x2cb   :  { %1548 = vsyncpa [#allocation4], 1 }
 0x2cc   :  { %1550 = vsyncpa [#allocation4 + $0x1], 1 }

</bundles_post_ra>
